<compile_context>
chip_gen: v7x
topology: tpu7x:2x2x1
jax: 0.10.0
libtpu: 0.0.40
codegen_flags: <defaults>
</compile_context>

<pallas_src>
import functools
import math

import jax
import jax.numpy as jnp
from jax.experimental import pallas as pl
from jax.experimental.pallas import tpu as pltpu

_MASK_VALUE = -0.7 * float(jnp.finfo(jnp.float32).max)


# ----------------------------------------------------------------------------
# helpers
# ----------------------------------------------------------------------------
def _round_up(n, m):
    return ((n + m - 1) // m) * m


def _pick_tile(dim, target, mult):
    """Largest divisor of `dim` that is <= target and a multiple of `mult`."""
    if dim <= target:
        return dim
    for t in range(target, mult - 1, -1):
        if dim % t == 0 and t % mult == 0:
            return t
    return dim


def _layernorm_f32(x, g, b, eps=1e-5):
    # LayerNorm(x.float()): always computed in float32.
    xf = x.astype(jnp.float32)
    mu = jnp.mean(xf, axis=-1, keepdims=True)
    var = jnp.mean(jnp.square(xf - mu), axis=-1, keepdims=True)
    return (xf - mu) * jax.lax.rsqrt(var + eps) * g + b


def _device_vmem_bytes():
    try:
        return int(pltpu.get_tpu_info().vmem_capacity_bytes)
    except Exception:
        return 64 << 20  # conservative default (v7x per-TensorCore VMEM)


def _vmem_limit(entries):
    """Scoped-VMEM request from tile arithmetic, capped by the device VMEM.

    `entries` = list of (shape, dtype, n_buffers).  Adds headroom for Mosaic
    internal scratch; never exceeds ~85% of the physical per-core VMEM.
    """
    total = sum(math.prod(s) * jnp.dtype(d).itemsize * n for s, d, n in entries)
    cap = int(_device_vmem_bytes() * 0.85)
    want = (total * 3) // 2 + (4 << 20)
    return max(16 << 20, min(want, cap))


# One-time capability probe: can grid-constant inputs be single-buffered?
_BUFFERED1_OK = None


def _buffered1_supported():
    global _BUFFERED1_OK
    if _BUFFERED1_OK is None:
        def _probe(i_ref, o_ref):
            o_ref[...] = i_ref[...] + 1.0

        try:
            fn = pl.pallas_call(
                _probe,
                grid=(2,),
                in_specs=[pl.BlockSpec((8, 128), lambda i: (0, 0),
                                       pipeline_mode=pl.Buffered(1))],
                out_specs=pl.BlockSpec((8, 128), lambda i: (0, 0)),
                out_shape=jax.ShapeDtypeStruct((8, 128), jnp.float32))
            jax.block_until_ready(fn(jnp.zeros((8, 128), jnp.float32)))
            _BUFFERED1_OK = True
        except Exception:
            _BUFFERED1_OK = False
    return _BUFFERED1_OK


# ----------------------------------------------------------------------------
# kernel 1: LN1 + fused QKV projection, head-major outputs (per sequence tile)
# ----------------------------------------------------------------------------
def _ln_qkv_kernel(n_head, q_scale, x_ref, g_ref, b_ref, w_ref, bias_ref,
                   q_ref, k_ref, v_ref):
    x = x_ref[0]                                   # (tS, D)
    tS, D = x.shape
    dh = D // n_head
    # LayerNorm in f32 (LayerNorm casts to float), back to x.dtype, then to
    # the matmul operand dtype (Linear casts its weight to x.dtype).
    ln = _layernorm_f32(x, g_ref[0], b_ref[0]).astype(x.dtype).astype(w_ref.dtype)
    # One fused (tS, D) @ (D, 3D) MXU launch for Q, K, V (K bias is zero).
    qkv = jnp.dot(ln, w_ref[...], preferred_element_type=jnp.float32) + bias_ref[0]
    # Fold both dh**-0.25 scalings into q: single multiply, identical math.
    q = (qkv[:, :D] * q_scale).astype(q_ref.dtype)
    k = qkv[:, D:2 * D].astype(k_ref.dtype)
    v = qkv[:, 2 * D:].astype(v_ref.dtype)
    # Head-major relayouts, once per sequence tile (amortized over every KV
    # step of kernel 2).  Built only from 2-D transposes, leading-dim reshapes
    # and last-two-dim swaps, which Mosaic lowers natively.
    k_ref[0] = k.T.reshape(n_head, dh, tS)                    # (H, dh, tS)
    q_ref[0] = q.T.reshape(n_head, dh, tS).swapaxes(1, 2)     # (H, tS, dh)
    v_ref[0] = v.T.reshape(n_head, dh, tS).swapaxes(1, 2)     # (H, tS, dh)


# ----------------------------------------------------------------------------
# kernel 2: flash attention over KV tiles (heads batched) + Wo + residual
# ----------------------------------------------------------------------------
def _attn_kernel(seq_len, mask_value, approx_recip,
                 x_ref, q_ref, k_ref, v_ref, wo_ref, bo_ref, o_ref,
                 m_sc, l_sc, acc_sc):
    ki = pl.program_id(2)

    @pl.when(ki == 0)
    def _init():
        m_sc[...] = jnp.full_like(m_sc, -jnp.inf)
        l_sc[...] = jnp.zeros_like(l_sc)
        acc_sc[...] = jnp.zeros_like(acc_sc)

    q = q_ref[0]                                   # (H, tQ, dh), scaled by dh**-0.5
    k = k_ref[0]                                   # (H, dh, tK), pre-transposed
    v = v_ref[0]                                   # (H, tK, dh)
    n_head, tQ, dh = q.shape
    tK = k.shape[-1]

    # All heads in one batched MXU matmul; K is pre-transposed so this is a
    # plain (tQ, dh) @ (dh, tK) per head — no per-step XLU transpose.
    s = jax.lax.dot_general(q, k, (((2,), (1,)), ((0,), (0,))),
                            preferred_element_type=jnp.float32)   # (H, tQ, tK)
    if seq_len is not None:                        # static: sequence was padded
        col = ki * tK + jax.lax.broadcasted_iota(jnp.int32, (1, 1, tK), 2)
        s = jnp.where(col < seq_len, s, mask_value)

    m_prev = m_sc[...]
    m_new = jnp.maximum(m_prev, jnp.max(s, axis=-1, keepdims=True))
    alpha = jnp.exp(m_prev - m_new)
    # TODO(synk): on v6e/v7x this exp could run in bf16 (EUP ~2x) at a small
    # accuracy cost; kept in f32 for the bit-faithful path.
    p = jnp.exp(s - m_new)
    l_sc[...] = alpha * l_sc[...] + jnp.sum(p, axis=-1, keepdims=True)
    pv = jax.lax.dot_general(p.astype(v.dtype), v, (((2,), (1,)), ((0,), (0,))),
                             preferred_element_type=jnp.float32)  # (H, tQ, dh)
    acc_sc[...] = alpha * acc_sc[...] + pv
    m_sc[...] = m_new

    @pl.when(ki == pl.num_programs(2) - 1)
    def _finalize():
        inv_l = pl.reciprocal(l_sc[...], approx=approx_recip)     # (H, tQ, 1)
        wv = (acc_sc[...] * inv_l).astype(wo_ref.dtype)           # (H, tQ, dh)
        # (H, tQ, dh) -> (tQ, D): batched minor transpose + leading-dim merge
        # + one 2-D transpose; done once per query tile.
        wv = wv.swapaxes(1, 2).reshape(n_head * dh, tQ).T         # (tQ, D)
        attn = jnp.dot(wv, wo_ref[...],
                       preferred_element_type=jnp.float32) + bo_ref[0]
        o_ref[0] = (x_ref[0].astype(jnp.float32) + attn).astype(o_ref.dtype)


# ----------------------------------------------------------------------------
# kernel 3: LN2 + MLP (rows span batch*seq, hidden dim chunked) + residual
# ----------------------------------------------------------------------------
def _mlp_kernel(gelu_approximate, x_ref, g_ref, b_ref, w1_ref, b1_ref,
                w2_ref, b2_ref, o_ref, ln_sc, acc_sc):
    c = pl.program_id(1)

    @pl.when(c == 0)
    def _init():
        ln = _layernorm_f32(x_ref[...], g_ref[0], b_ref[0]).astype(x_ref.dtype)
        ln_sc[...] = ln.astype(ln_sc.dtype)        # cache LN2 across hidden chunks
        acc_sc[...] = jnp.zeros_like(acc_sc)

    # One n_mlp chunk per grid step: stream a (D, tH) column block of W1 and a
    # (tH, D) row block of W2, accumulate the partial product in f32 scratch.
    h = jnp.dot(ln_sc[...], w1_ref[...],
                preferred_element_type=jnp.float32) + b1_ref[0]
    # nn.GELU() default is exact erf; approximate='tanh' is an opt-in,
    # numerics-changing fast path (mostly useful on v5e).
    h = jax.nn.gelu(h, approximate=gelu_approximate)
    acc_sc[...] += jnp.dot(h.astype(w2_ref.dtype), w2_ref[...],
                           preferred_element_type=jnp.float32)

    @pl.when(c == pl.num_programs(1) - 1)
    def _finalize():
        o_ref[...] = (x_ref[...].astype(jnp.float32) + acc_sc[...]
                      + b2_ref[0]).astype(o_ref.dtype)


# ----------------------------------------------------------------------------
# wrapper
# ----------------------------------------------------------------------------
def residual_attention_block(x, p, n_head, *, compute_dtype=None,
                             tile_q=None, tile_kv=None, tile_h=None,
                             tile_m=None, gelu_approximate=False):
    """Forward pass of the Whisper residual attention block (mask=None path).

    compute_dtype: dtype of the matmul operands (e.g. jnp.bfloat16 to run the
    MXU in bf16 with f32 accumulation).  None = x.dtype (bit-faithful path).
    """
    B, T, D = x.shape
    assert D % n_head == 0, "n_state must be divisible by n_head"
    dh = D // n_head
    n_mlp = 4 * D
    cdt = jnp.dtype(compute_dtype) if compute_dtype is not None else jnp.dtype(x.dtype)
    mult = 16 if cdt == jnp.dtype(jnp.bfloat16) else 8

    small_vmem = _device_vmem_bytes() < (96 << 20)   # e.g. v7x: 64 MiB per core

    # ---- sequence (query) tile + padded length ----
    if tile_q is not None:
        tQ = int(tile_q)
    elif T <= 256:
        tQ = _round_up(T, mult)
    elif T < 1024 or small_vmem:
        tQ = 128
    else:
        tQ = 256
    T_pad = _round_up(T, tQ)
    # Kernel 1 writes K pre-transposed with the sequence tile on the lane
    # axis, so the tile must be a multiple of 128 unless it is the full
    # (padded) sequence.
    if tQ != T_pad and tQ % 128 != 0:
        tQ = T_pad
    nT = T_pad // tQ

    # ---- key/value tile ----
    kv_cap = 256 if small_vmem else 512
    if tile_kv is not None:
        tK = int(tile_kv)
    elif T_pad <= kv_cap:
        tK = T_pad     # K/V resident across query tiles: no re-DMA, nK = 1
    else:
        tK = kv_cap if T_pad % kv_cap == 0 else (256 if T_pad % 256 == 0 else 128)
    if T_pad % tK != 0 or (tK != T_pad and tK % 128 != 0):
        tK = T_pad
    nK = T_pad // tK

    # ---- MLP tiles: rows span flattened (batch, seq); hidden dim chunked ----
    R = B * T_pad
    tM = int(tile_m) if tile_m is not None else _pick_tile(R, 512, mult)
    if R % tM != 0:
        tM = _pick_tile(R, 512, mult)
    nM = R // tM
    tH = int(tile_h) if tile_h is not None else _pick_tile(n_mlp, 1024, 128)
    if n_mlp % tH != 0 or (tH != n_mlp and tH % 128 != 0):
        tH = _pick_tile(n_mlp, 1024, 128)
    nC = n_mlp // tH

    seq_len = T if T_pad != T else None      # static: padded keys need masking

    # ---- parameter prep (cast to matmul operand dtype in the wrapper) ----
    cast = lambda a: a.astype(cdt)
    w_qkv = cast(jnp.concatenate([p["wq"], p["wk"], p["wv"]], axis=1))   # (D, 3D)
    b_qkv = cast(jnp.concatenate(
        [p["bq"], jnp.zeros_like(p["bq"]), p["bv"]], axis=1))            # (1, 3D)
    wo, bo = cast(p["wo"]), cast(p["bo"])
    w1, b1, w2, b2 = cast(p["w1"]), cast(p["b1"]), cast(p["w2"]), cast(p["b2"])

    x_pad = x if T_pad == T else jnp.pad(x, ((0, 0), (0, T_pad - T), (0, 0)))

    single = _buffered1_supported()
    wbuf = 1 if single else 2

    def const_spec(shape):
        # Grid-constant inputs: single-buffer when the build supports it.
        idx = lambda *_: (0,) * len(shape)
        if single:
            return pl.BlockSpec(shape, idx, pipeline_mode=pl.Buffered(1))
        return pl.BlockSpec(shape, idx)

    # ---------------- kernel 1: LN1 + fused QKV (head-major outputs) --------
    q_hm, k_hm, v_hm = pl.pallas_call(
        functools.partial(_ln_qkv_kernel, n_head, float(dh) ** -0.5),
        grid=(B, nT),
        in_specs=[pl.BlockSpec((1, tQ, D), lambda b, t: (b, t, 0)),
                  const_spec((1, D)), const_spec((1, D)),
                  const_spec((D, 3 * D)), const_spec((1, 3 * D))],
        out_specs=[pl.BlockSpec((1, n_head, tQ, dh), lambda b, t: (b, 0, t, 0)),
                   pl.BlockSpec((1, n_head, dh, tQ), lambda b, t: (b, 0, 0, t)),
                   pl.BlockSpec((1, n_head, tQ, dh), lambda b, t: (b, 0, t, 0))],
        out_shape=[jax.ShapeDtypeStruct((B, n_head, T_pad, dh), cdt),
                   jax.ShapeDtypeStruct((B, n_head, dh, T_pad), cdt),
                   jax.ShapeDtypeStruct((B, n_head, T_pad, dh), cdt)],
        compiler_params=pltpu.CompilerParams(
            dimension_semantics=("parallel", "parallel"),
            vmem_limit_bytes=_vmem_limit([
                ((tQ, D), x.dtype, 2),
                ((tQ, 3 * D), jnp.float32, 2),       # qkv f32 + relayout temps
                ((D, 3 * D), cdt, wbuf),
                ((1, 3 * D), cdt, wbuf),
                ((1, D), jnp.float32, 2 * wbuf),
                ((n_head, tQ, dh), cdt, 3 * 2),      # q/k/v output blocks
            ])),
    )(x_pad, p["ln1_g"], p["ln1_b"], w_qkv, b_qkv)

    # ---------------- kernel 2: flash attention + Wo + residual -------------
    x_spec = pl.BlockSpec((1, tQ, D), lambda b, qi, ki: (b, qi, 0))
    x1 = pl.pallas_call(
        functools.partial(_attn_kernel, seq_len, _MASK_VALUE,
                          cdt != jnp.dtype(jnp.float32)),
        grid=(B, nT, nK),
        in_specs=[x_spec,
                  pl.BlockSpec((1, n_head, tQ, dh), lambda b, qi, ki: (b, 0, qi, 0)),
                  pl.BlockSpec((1, n_head, dh, tK), lambda b, qi, ki: (b, 0, 0, ki)),
                  pl.BlockSpec((1, n_head, tK, dh), lambda b, qi, ki: (b, 0, ki, 0)),
                  const_spec((D, D)), const_spec((1, D))],
        out_specs=pl.BlockSpec((1, tQ, D), lambda b, qi, ki: (b, qi, 0)),
        out_shape=jax.ShapeDtypeStruct((B, T_pad, D), x.dtype),
        scratch_shapes=[pltpu.VMEM((n_head, tQ, 1), jnp.float32),   # m
                        pltpu.VMEM((n_head, tQ, 1), jnp.float32),   # l
                        pltpu.VMEM((n_head, tQ, dh), jnp.float32)], # acc
        compiler_params=pltpu.CompilerParams(
            dimension_semantics=("parallel", "parallel", "arbitrary"),
            vmem_limit_bytes=_vmem_limit([
                ((tQ, D), x.dtype, 2 + 2),                 # x block + output
                ((n_head, tQ, dh), cdt, 2),                # q
                ((n_head, dh, tK), cdt, 2),                # k
                ((n_head, tK, dh), cdt, 2),                # v
                ((D, D), cdt, wbuf), ((1, D), cdt, wbuf),
                ((n_head, tQ, 128), jnp.float32, 2),       # m, l (lane-padded)
                ((n_head, tQ, dh), jnp.float32, 1),        # acc
                ((n_head, tQ, tK), jnp.float32, 2),        # score/prob temps
            ])),
    )(x_pad, q_hm, k_hm, v_hm, wo, bo)

    # ---------------- kernel 3: LN2 + MLP + residual -------------------------
    out_rows = pl.pallas_call(
        functools.partial(_mlp_kernel, gelu_approximate),
        grid=(nM, nC),
        in_specs=[pl.BlockSpec((tM, D), lambda m, c: (m, 0)),
                  const_spec((1, D)), const_spec((1, D)),
                  pl.BlockSpec((D, tH), lambda m, c: (0, c)),    # W1 cols
                  pl.BlockSpec((1, tH), lambda m, c: (0, c)),    # b1 chunk
                  pl.BlockSpec((tH, D), lambda m, c: (c, 0)),    # W2 rows
                  const_spec((1, D))],
        out_specs=pl.BlockSpec((tM, D), lambda m, c: (m, 0)),
        out_shape=jax.ShapeDtypeStruct((R, D), x.dtype),
        scratch_shapes=[pltpu.VMEM((tM, D), cdt),           # cached LN2
                        pltpu.VMEM((tM, D), jnp.float32)],  # MLP accumulator
        compiler_params=pltpu.CompilerParams(
            dimension_semantics=("parallel", "arbitrary"),
            vmem_limit_bytes=_vmem_limit([
                ((tM, D), x.dtype, 2 + 2),
                ((1, D), jnp.float32, 2 * wbuf),
                ((D, tH), cdt, 2), ((1, tH), cdt, 2), ((tH, D), cdt, 2),
                ((1, D), cdt, wbuf),
                ((tM, D), cdt, 1), ((tM, D), jnp.float32, 1),
                ((tM, tH), jnp.float32, 2),                 # hidden activation
            ])),
    )(x1.reshape(R, D), p["ln2_g"], p["ln2_b"], w1, b1, w2, b2)

    out = out_rows.reshape(B, T_pad, D)
    return out if T_pad == T else out[:, :T, :]


# ----------------------------------------------------------------------------
# synthetic parameters + pure-JAX reference
# ----------------------------------------------------------------------------
def make_params(key, n_state, n_head):
    """Deterministic synthetic parameters in (in, out) layout, biases (1, D)."""
    n_mlp = 4 * n_state
    ks = jax.random.split(key, 11)
    s = 0.02

    def w(k, out_f, in_f):
        return (s * jax.random.normal(k, (out_f, in_f), jnp.float32)).T   # (in, out)

    def bias(k, f):
        return s * jax.random.normal(k, (1, f), jnp.float32)

    return {
        "ln1_g": jnp.ones((1, n_state), jnp.float32),
        "ln1_b": jnp.zeros((1, n_state), jnp.float32),
        "wq": w(ks[0], n_state, n_state), "bq": bias(ks[1], n_state),
        "wk": w(ks[2], n_state, n_state),
        "wv": w(ks[3], n_state, n_state), "bv": bias(ks[4], n_state),
        "wo": w(ks[5], n_state, n_state), "bo": bias(ks[6], n_state),
        "ln2_g": jnp.ones((1, n_state), jnp.float32),
        "ln2_b": jnp.zeros((1, n_state), jnp.float32),
        "w1": w(ks[7], n_mlp, n_state), "b1": bias(ks[8], n_mlp),
        "w2": w(ks[9], n_state, n_mlp), "b2": bias(ks[10], n_state),
    }


def reference(x, p, n_head):
    """Pure-JAX reference mirroring the PyTorch forward."""
    B, T, D = x.shape
    dh = D // n_head
    scale = float(dh) ** -0.25

    def ln(z, g, b):
        zf = z.astype(jnp.float32)
        mu = zf.mean(-1, keepdims=True)
        var = ((zf - mu) ** 2).mean(-1, keepdims=True)
        return (zf - mu) / jnp.sqrt(var + 1e-5) * g[0] + b[0]

    h0 = ln(x, p["ln1_g"], p["ln1_b"])
    q = h0 @ p["wq"] + p["bq"][0]
    k = h0 @ p["wk"]
    v = h0 @ p["wv"] + p["bv"][0]
    q = q.reshape(B, T, n_head, dh).transpose(0, 2, 1, 3) * scale
    k = k.reshape(B, T, n_head, dh).transpose(0, 2, 3, 1) * scale
    v = v.reshape(B, T, n_head, dh).transpose(0, 2, 1, 3)
    qk = (q @ k).astype(jnp.float32)
    w = jax.nn.softmax(qk, axis=-1)
    wv = (w @ v).transpose(0, 2, 1, 3).reshape(B, T, D)
    x = x + wv @ p["wo"] + p["bo"][0]

    h1 = ln(x, p["ln2_g"], p["ln2_b"])
    h1 = jax.nn.gelu(h1 @ p["w1"] + p["b1"][0], approximate=False)
    return x + h1 @ p["w2"] + p["b2"][0]


# ----------------------------------------------------------------------------
# tests
# ----------------------------------------------------------------------------
if __name__ == "__main__":
    root = jax.random.PRNGKey(0)
    k1, k2, k3, k4 = jax.random.split(root, 4)

    # test 1: tiny single-tile shapes, exact f32 path.
    B, T, D, H = 2, 8, 32, 4
    x = jax.random.normal(k1, (B, T, D), jnp.float32)
    p = make_params(k2, D, H)
    out = jax.block_until_ready(residual_attention_block(x, p, H))
    ref = reference(x, p, H)
    assert out.shape == (B, T, D)
    err = float(jnp.max(jnp.abs(out - ref)))
    assert jnp.allclose(out, ref, atol=1e-4, rtol=1e-4), f"test1 max err {err}"

    # test 2: padded + multi-tile path: T=200 -> T_pad=256, 2 query tiles x
    # 2 KV tiles (padded-key masking), 2 MLP hidden chunks, 2 MLP row tiles.
    B, T, D, H = 2, 200, 64, 4
    x = jax.random.normal(k3, (B, T, D), jnp.float32)
    p = make_params(k4, D, H)
    out = jax.block_until_ready(
        residual_attention_block(x, p, H, tile_q=128, tile_kv=128,
                                 tile_h=128, tile_m=256))
    ref = reference(x, p, H)
    err = float(jnp.max(jnp.abs(out - ref)))
    assert jnp.allclose(out, ref, atol=1e-4, rtol=1e-4), f"test2 max err {err}"

    # test 3: bf16 matmul operands with f32 accumulation (MXU-native path),
    # default (auto) tiling with padding + masking.
    out_bf16 = jax.block_until_ready(
        residual_attention_block(x, p, H, compute_dtype=jnp.bfloat16))
    err = float(jnp.max(jnp.abs(out_bf16 - ref)))
    assert jnp.allclose(out_bf16, ref, atol=5e-2, rtol=5e-2), f"test3 max err {err}"

    print("KERNEL_OK")
</pallas_src>

<mosaic_0001>
module attributes {stable_mosaic.version = 11 : i64} {
  func.func @_probe(%arg0: i32, %arg1: memref<8x128xf32, #tpu.memory_space<vmem>>, %arg2: memref<8x128xf32, #tpu.memory_space<vmem>>) attributes {dimension_semantics = [#tpu.dimension_semantics<arbitrary>], iteration_bounds = array<i64: 2>, scalar_prefetch = 0 : i64, scratch_operands = 0 : i64, tpu.core_type = #tpu.core_type<tc>, window_params = [{pipeline_mode = #tpu.pipeline_mode<synchronous>, transform_indices = @transform_0, window_bounds = array<i64: 8, 128>}, {pipeline_mode = #tpu.pipeline_mode<synchronous>, transform_indices = @transform_1, window_bounds = array<i64: 8, 128>}]} {
    %c0 = arith.constant 0 : index
    %c0_0 = arith.constant 0 : index
    %0 = vector.load %arg1[%c0, %c0_0] : memref<8x128xf32, #tpu.memory_space<vmem>>, vector<8x128xf32>
    %cst = arith.constant 1.000000e+00 : f32
    %1 = vector.broadcast %cst : f32 to vector<8x128xf32>
    %2 = arith.addf %0, %1 : vector<8x128xf32>
    %c0_1 = arith.constant 0 : index
    %c0_2 = arith.constant 0 : index
    %3 = vector.load %arg2[%c0_1, %c0_2] : memref<8x128xf32, #tpu.memory_space<vmem>>, vector<8x128xf32>
    tpu.vector_store %arg2[%c0_1, %c0_2], %2 {strides = array<i32>} : memref<8x128xf32, #tpu.memory_space<vmem>>, vector<8x128xf32>,
    return
  }
  func.func @transform_0(%arg0: i32) -> (i32, i32) {
    %c0_i32 = arith.constant 0 : i32
    %c0_i32_0 = arith.constant 0 : i32
    %c0_i32_1 = arith.constant 0 : i32
    return %c0_i32, %c0_i32_0 : i32, i32
  }
  func.func @transform_1(%arg0: i32) -> (i32, i32) {
    %c0_i32 = arith.constant 0 : i32
    %c0_i32_0 = arith.constant 0 : i32
    %c0_i32_1 = arith.constant 0 : i32
    return %c0_i32, %c0_i32_0 : i32, i32
  }
}

module attributes {stable_mosaic.version = 11 : i64} {
  func.func @_ln_qkv_kernel(%arg0: i32, %arg1: i32, %arg2: memref<1x8x32xf32, #tpu.memory_space<vmem>>, %arg3: memref<1x32xf32, #tpu.memory_space<vmem>>, %arg4: memref<1x32xf32, #tpu.memory_space<vmem>>, %arg5: memref<32x96xf32, #tpu.memory_space<vmem>>, %arg6: memref<1x96xf32, #tpu.memory_space<vmem>>, %arg7: memref<1x4x8x8xf32, #tpu.memory_space<vmem>>, %arg8: memref<1x4x8x8xf32, #tpu.memory_space<vmem>>, %arg9: memref<1x4x8x8xf32, #tpu.memory_space<vmem>>) attributes {dimension_semantics = [#tpu.dimension_semantics<parallel>, #tpu.dimension_semantics<parallel>], iteration_bounds = array<i64: 2, 1>, scalar_prefetch = 0 : i64, scratch_operands = 0 : i64, tpu.core_type = #tpu.core_type<tc>, window_params = [{transform_indices = @transform_0, window_bounds = array<i64: 1, 8, 32>}, {pipeline_mode = #tpu.pipeline_mode<synchronous>, transform_indices = @transform_1, window_bounds = array<i64: 1, 32>}, {pipeline_mode = #tpu.pipeline_mode<synchronous>, transform_indices = @transform_2, window_bounds = array<i64: 1, 32>}, {pipeline_mode = #tpu.pipeline_mode<synchronous>, transform_indices = @transform_3, window_bounds = array<i64: 32, 96>}, {pipeline_mode = #tpu.pipeline_mode<synchronous>, transform_indices = @transform_4, window_bounds = array<i64: 1, 96>}, {transform_indices = @transform_5, window_bounds = array<i64: 1, 4, 8, 8>}, {transform_indices = @transform_6, window_bounds = array<i64: 1, 4, 8, 8>}, {transform_indices = @transform_7, window_bounds = array<i64: 1, 4, 8, 8>}]} {
    %c0 = arith.constant 0 : index
    %c0_0 = arith.constant 0 : index
    %c0_1 = arith.constant 0 : index
    %0 = vector.load %arg2[%c0, %c0_0, %c0_1] : memref<1x8x32xf32, #tpu.memory_space<vmem>>, vector<1x8x32xf32>
    %1 = vector.shape_cast %0 : vector<1x8x32xf32> to vector<8x32xf32>
    %c0_2 = arith.constant 0 : index
    %c0_3 = arith.constant 0 : index
    %2 = vector.load %arg3[%c0_2, %c0_3] : memref<1x32xf32, #tpu.memory_space<vmem>>, vector<1x32xf32>
    %3 = vector.shape_cast %2 : vector<1x32xf32> to vector<32xf32>
    %c0_4 = arith.constant 0 : index
    %c0_5 = arith.constant 0 : index
    %4 = vector.load %arg4[%c0_4, %c0_5] : memref<1x32xf32, #tpu.memory_space<vmem>>, vector<1x32xf32>
    %5 = vector.shape_cast %4 : vector<1x32xf32> to vector<32xf32>
    %cst = arith.constant dense<0.000000e+00> : vector<8xf32>
    %6 = vector.multi_reduction <add>, %1, %cst [1] : vector<8x32xf32> to vector<8xf32>
    %7 = vector.shape_cast %6 : vector<8xf32> to vector<8x1xf32>
    %cst_6 = arith.constant 3.200000e+01 : f32
    %8 = vector.broadcast %cst_6 : f32 to vector<8x1xf32>
    %9 = arith.divf %7, %8 : vector<8x1xf32>
    %10 = vector.broadcast %9 : vector<8x1xf32> to vector<8x32xf32>
    %11 = arith.subf %1, %10 : vector<8x32xf32>
    %12 = arith.mulf %11, %11 : vector<8x32xf32>
    %cst_7 = arith.constant dense<0.000000e+00> : vector<8xf32>
    %13 = vector.multi_reduction <add>, %12, %cst_7 [1] : vector<8x32xf32> to vector<8xf32>
    %14 = vector.shape_cast %13 : vector<8xf32> to vector<8x1xf32>
    %cst_8 = arith.constant 3.200000e+01 : f32
    %15 = vector.broadcast %cst_8 : f32 to vector<8x1xf32>
    %16 = arith.divf %14, %15 : vector<8x1xf32>
    %17 = vector.broadcast %9 : vector<8x1xf32> to vector<8x32xf32>
    %18 = arith.subf %1, %17 : vector<8x32xf32>
    %cst_9 = arith.constant 9.99999974E-6 : f32
    %19 = vector.broadcast %cst_9 : f32 to vector<8x1xf32>
    %20 = arith.addf %16, %19 : vector<8x1xf32>
    %21 = math.rsqrt %20 : vector<8x1xf32>
    %22 = vector.broadcast %21 : vector<8x1xf32> to vector<8x32xf32>
    %23 = arith.mulf %18, %22 : vector<8x32xf32>
    %24 = vector.shape_cast %3 : vector<32xf32> to vector<1x32xf32>
    %25 = vector.broadcast %24 : vector<1x32xf32> to vector<8x32xf32>
    %26 = arith.mulf %23, %25 : vector<8x32xf32>
    %27 = vector.shape_cast %5 : vector<32xf32> to vector<1x32xf32>
    %28 = vector.broadcast %27 : vector<1x32xf32> to vector<8x32xf32>
    %29 = arith.addf %26, %28 : vector<8x32xf32>
    %c0_10 = arith.constant 0 : index
    %c0_11 = arith.constant 0 : index
    %30 = vector.load %arg5[%c0_10, %c0_11] : memref<32x96xf32, #tpu.memory_space<vmem>>, vector<32x96xf32>
    %cst_12 = arith.constant dense<0.000000e+00> : vector<8x96xf32>
    %31 = tpu.matmul %29, %30, %cst_12 {dimension_numbers = #tpu.dot_dimension_numbers<[1], [0], [0], [1], [0, 0, 1, 1], [], []>} : vector<8x32xf32>, vector<32x96xf32>, vector<8x96xf32> -> vector<8x96xf32>
    %c0_13 = arith.constant 0 : index
    %c0_14 = arith.constant 0 : index
    %32 = vector.load %arg6[%c0_13, %c0_14] : memref<1x96xf32, #tpu.memory_space<vmem>>, vector<1x96xf32>
    %33 = vector.shape_cast %32 : vector<1x96xf32> to vector<96xf32>
    %34 = vector.shape_cast %33 : vector<96xf32> to vector<1x96xf32>
    %35 = vector.broadcast %34 : vector<1x96xf32> to vector<8x96xf32>
    %36 = arith.addf %31, %35 : vector<8x96xf32>
    %37 = vector.extract_strided_slice %36 {offsets = [0, 0], sizes = [8, 32], strides = [1, 1]} : vector<8x96xf32> to vector<8x32xf32>
    %cst_15 = arith.constant 0.353553385 : f32
    %38 = vector.broadcast %cst_15 : f32 to vector<8x32xf32>
    %39 = arith.mulf %37, %38 : vector<8x32xf32>
    %40 = vector.extract_strided_slice %36 {offsets = [0, 32], sizes = [8, 32], strides = [1, 1]} : vector<8x96xf32> to vector<8x32xf32>
    %41 = vector.extract_strided_slice %36 {offsets = [0, 64], sizes = [8, 32], strides = [1, 1]} : vector<8x96xf32> to vector<8x32xf32>
    %42 = tpu.transpose %40, [1, 0] : vector<8x32xf32> -> vector<32x8xf32>
    %43 = vector.shape_cast %42 : vector<32x8xf32> to vector<4x8x8xf32>
    %c0_16 = arith.constant 0 : index
    %c0_17 = arith.constant 0 : index
    %c0_18 = arith.constant 0 : index
    %c0_19 = arith.constant 0 : index
    %44 = vector.load %arg8[%c0_16, %c0_17, %c0_18, %c0_19] : memref<1x4x8x8xf32, #tpu.memory_space<vmem>>, vector<1x4x8x8xf32>
    %45 = vector.shape_cast %44 : vector<1x4x8x8xf32> to vector<4x8x8xf32>
    %46 = vector.shape_cast %43 : vector<4x8x8xf32> to vector<1x4x8x8xf32>
    tpu.vector_store %arg8[%c0_16, %c0_17, %c0_18, %c0_19], %46 {strides = array<i32>} : memref<1x4x8x8xf32, #tpu.memory_space<vmem>>, vector<1x4x8x8xf32>,
    %47 = tpu.transpose %39, [1, 0] : vector<8x32xf32> -> vector<32x8xf32>
    %48 = vector.shape_cast %47 : vector<32x8xf32> to vector<4x8x8xf32>
    %49 = tpu.transpose %48, [0, 2, 1] : vector<4x8x8xf32> -> vector<4x8x8xf32>
    %c0_20 = arith.constant 0 : index
    %c0_21 = arith.constant 0 : index
    %c0_22 = arith.constant 0 : index
    %c0_23 = arith.constant 0 : index
    %50 = vector.load %arg7[%c0_20, %c0_21, %c0_22, %c0_23] : memref<1x4x8x8xf32, #tpu.memory_space<vmem>>, vector<1x4x8x8xf32>
    %51 = vector.shape_cast %50 : vector<1x4x8x8xf32> to vector<4x8x8xf32>
    %52 = vector.shape_cast %49 : vector<4x8x8xf32> to vector<1x4x8x8xf32>
    tpu.vector_store %arg7[%c0_20, %c0_21, %c0_22, %c0_23], %52 {strides = array<i32>} : memref<1x4x8x8xf32, #tpu.memory_space<vmem>>, vector<1x4x8x8xf32>,
    %53 = tpu.transpose %41, [1, 0] : vector<8x32xf32> -> vector<32x8xf32>
    %54 = vector.shape_cast %53 : vector<32x8xf32> to vector<4x8x8xf32>
    %55 = tpu.transpose %54, [0, 2, 1] : vector<4x8x8xf32> -> vector<4x8x8xf32>
    %c0_24 = arith.constant 0 : index
    %c0_25 = arith.constant 0 : index
    %c0_26 = arith.constant 0 : index
    %c0_27 = arith.constant 0 : index
    %56 = vector.load %arg9[%c0_24, %c0_25, %c0_26, %c0_27] : memref<1x4x8x8xf32, #tpu.memory_space<vmem>>, vector<1x4x8x8xf32>
    %57 = vector.shape_cast %56 : vector<1x4x8x8xf32> to vector<4x8x8xf32>
    %58 = vector.shape_cast %55 : vector<4x8x8xf32> to vector<1x4x8x8xf32>
    tpu.vector_store %arg9[%c0_24, %c0_25, %c0_26, %c0_27], %58 {strides = array<i32>} : memref<1x4x8x8xf32, #tpu.memory_space<vmem>>, vector<1x4x8x8xf32>,
    return
  }
  func.func @transform_0(%arg0: i32, %arg1: i32) -> (i32, i32, i32) {
    %c0_i32 = arith.constant 0 : i32
    %c0_i32_0 = arith.constant 0 : i32
    return %arg0, %arg1, %c0_i32 : i32, i32, i32
  }
  func.func @transform_1(%arg0: i32, %arg1: i32) -> (i32, i32) {
    %c0_i32 = arith.constant 0 : i32
    %c0_i32_0 = arith.constant 0 : i32
    %c0_i32_1 = arith.constant 0 : i32
    return %c0_i32, %c0_i32_0 : i32, i32
  }
  func.func @transform_2(%arg0: i32, %arg1: i32) -> (i32, i32) {
    %c0_i32 = arith.constant 0 : i32
    %c0_i32_0 = arith.constant 0 : i32
    %c0_i32_1 = arith.constant 0 : i32
    return %c0_i32, %c0_i32_0 : i32, i32
  }
  func.func @transform_3(%arg0: i32, %arg1: i32) -> (i32, i32) {
    %c0_i32 = arith.constant 0 : i32
    %c0_i32_0 = arith.constant 0 : i32
    %c0_i32_1 = arith.constant 0 : i32
    return %c0_i32, %c0_i32_0 : i32, i32
  }
  func.func @transform_4(%arg0: i32, %arg1: i32) -> (i32, i32) {
    %c0_i32 = arith.constant 0 : i32
    %c0_i32_0 = arith.constant 0 : i32
    %c0_i32_1 = arith.constant 0 : i32
    return %c0_i32, %c0_i32_0 : i32, i32
  }
  func.func @transform_5(%arg0: i32, %arg1: i32) -> (i32, i32, i32, i32) {
    %c0_i32 = arith.constant 0 : i32
    %c0_i32_0 = arith.constant 0 : i32
    %c0_i32_1 = arith.constant 0 : i32
    return %arg0, %c0_i32, %arg1, %c0_i32_0 : i32, i32, i32, i32
  }
  func.func @transform_6(%arg0: i32, %arg1: i32) -> (i32, i32, i32, i32) {
    %c0_i32 = arith.constant 0 : i32
    %c0_i32_0 = arith.constant 0 : i32
    %c0_i32_1 = arith.constant 0 : i32
    return %arg0, %c0_i32, %c0_i32_0, %arg1 : i32, i32, i32, i32
  }
  func.func @transform_7(%arg0: i32, %arg1: i32) -> (i32, i32, i32, i32) {
    %c0_i32 = arith.constant 0 : i32
    %c0_i32_0 = arith.constant 0 : i32
    %c0_i32_1 = arith.constant 0 : i32
    return %arg0, %c0_i32, %arg1, %c0_i32_0 : i32, i32, i32, i32
  }
}

</mosaic_0001>

<bundles_post_ra>
// kernel: tpu_custom_call.1
= control target key start
LH: loop header
LB: loop body
LE: loop exit
PB: predicated region body
PF: predicated region fallthrough
CT: control target
= control target key end

     0   :  { %6 = vsyncpa [#allocation3], 0  ;;  %s341_s0 = inlined_call_operand.hbm [shape: f32[8,128], index: 0, kind: input, shape index: {}]   ;;  %s342_s1 = inlined_call_operand.hbm [shape: f32[8,128], index: 1, kind: output, shape index: {}]  }
   0x1   :  { %7 = vsyncpa [#allocation4], 0  ;;  %s262_s6 = smov 0  }
   0x2 LB: > { %s145_s7 = sadd.s32 4294967295, %s248_s6   ;;  %p146_p0 = scmp.ge.s32.totalorder %s248_s6, 1  ;;  %s248_s6 = sphi %s262_s6, %s13_s6  }
   0x3   : > { %p60_p1 = scmp.lt.s32.totalorder %s248_s6, 3  ;;  %p276_p3 = scmp.eq.s32.totalorder %s145_s7, 0 }
   0x4   : > { %s250_s10 = smov [#allocation2]   ;;  %s180_s15 = scalar_lea.hbm %s341_s0, 128 }
   0x5   : > { %p270_p2 = pnand %p146_p0, %p60_p1  ;;  %s73_s11 = sshll.u32 %s250_s10, 4  ;;  %s74_s11 = int_to_ptr.vmem [resolvable:$true] %s73_s11 }
   0x6   : > { %s347_s9 = scalar_select %p276_p3, 1, 0 }
   0x7   : > { %s346_s8 = scalar_select %p270_p2, 1, 0 }
   0x8   : > { %p162_p4 = pneg %p270_p2  ;;  %p181_p6 = scmp.ne.s32.totalorder %s341_s0, %s180_s15 }
   0x9   : > { %p187_p10 = scmp.lt.u32.totalorder %s180_s15, %s341_s0 }
   0xa   : > { %p284_p5 = pnand %p276_p3, %p162_p4 }
   0xc   : > { %p182_p7 = pneg %p284_p5 }
   0xe   : > { %p183_p8 = pnand %p182_p7, %p181_p6 }
  0x10   : > { %p184_p9 = pneg %p183_p8 }
  0x12   : > { %p189_p11 = pnand %p187_p10, %p184_p9 }
  0x14   : > { %192 = shalt.err (!%p189_p11)
}
  0x15   : > { %s193_s20 = scalar_lea.vmem %s74_s11, 128  ;;  %p201_p1 = scmp.lt.s32.totalorder %s74_s11, %s74_s11 }
  0x16   : > { %p194_p12 = scmp.ne.s32.totalorder %s74_s11, %s193_s20  ;;  %p202_p4 = scmp.lt.s32.totalorder %s193_s20, %s193_s20 }
  0x18   : > { %p196_p13 = pnand %p194_p12, %p182_p7  ;;  %p203_p3 = por %p202_p4, %p201_p1 }
  0x1a   : > { %p197_p0 = pneg %p196_p13 }
  0x1c   : > { %p204_p2 = pnand %p203_p3, %p197_p0 }
  0x1e   : > { %207 = shalt.err (!%p204_p2)
}
  0x1f   : > { %165 = dma.hbm_to_vmem [thread:$0]  (!%p284_p5), %s341_s0, 128, %s74_s11, [#allocation3]  }
  0x20   : > { %p349_p6 = scmp.ne.s32.totalorder %s346_s8, 0 }
  0x21   : > { %p350_p8 = scmp.ne.s32.totalorder (!%p349_p6), %s347_s9, 0 }
  0x22   : > { %86 = sbr.rel (%p349_p6) target bundleno = 67 (0x43), region = 24 }
  0x29   : > { %239 = dma.done.wait (%p350_p8), [#allocation3], 128  }
  0x2a   : > { %241 = vsyncadd (%p350_p8), [#allocation3], 4294967168  ;;  %s251_s23 = smov [#allocation5]   ;;  %v96_v0 = vld [vmem:[#allocation2] sm:$0xff]  ;;  %p312_p2 = scmp.eq.s32.totalorder %s145_s7, 1 }
  0x2b   : > { %s106_s24 = sshll.u32 %s251_s23, 4  ;;  %v97_v1 = vadd.f32 1.0, %v96_v0  ;;  %s107_s24 = int_to_ptr.vmem [resolvable:$true] %s106_s24 }
  0x2c   : > { %s208_s26 = scalar_lea.vmem %s107_s24, 128  ;;  %p215_p9 = scmp.lt.s32.totalorder %s107_s24, %s107_s24 }
  0x2d   : > { %98 = vst [vmem:[#allocation5] sm:$0xff] %v97_v1  ;;  %p209_p3 = scmp.ne.s32.totalorder %s107_s24, %s208_s26  ;;  %p216_p10 = scmp.lt.s32.totalorder %s208_s26, %s208_s26 }
  0x2f   : > { %p210_p5 = pnand %p209_p3, %p312_p2  ;;  %p217_p11 = por %p216_p10, %p215_p9 }
  0x31   : > { %p211_p7 = pneg %p210_p5 }
  0x33   : > { %p218_p12 = pnand %p217_p11, %p211_p7 }
  0x35   : > { %221 = shalt.err (!%p218_p12)
}
  0x36   : > { %s222_s29 = scalar_lea.hbm %s342_s1, 128 }
  0x37   : > { %p223_p13 = scmp.ne.s32.totalorder %s342_s1, %s222_s29  ;;  %p228_p4 = scmp.lt.u32.totalorder %s222_s29, %s342_s1 }
  0x39   : > { %p224_p0 = pnand %p223_p13, %p312_p2 }
  0x3b   : > { %p225_p1 = pneg %p224_p0 }
  0x3d   : > { %p230_p6 = pnand %p228_p4, %p225_p1 }
  0x3f   : > { %233 = shalt.err (!%p230_p6)
}
  0x40   : > { %159 = dma.vmem_to_hbm [thread:$0]  (%p312_p2), %s107_s24, 128, %s342_s1, [#allocation4]  }
  0x41   : > { %243 = dma.done.wait (%p312_p2), [#allocation4], 128  }
  0x42   : > { %245 = vsyncadd (%p312_p2), [#allocation4], 4294967168 }
  0x43 PF: > { %s13_s6 = sadd.s32 1, %s248_s6  }
  0x44   : > { %p10_p8 = scmp.ge.s32.totalorder %s13_s6, 4  }
  0x46   :  { %12 = sbr.rel (!%p10_p8) target bundleno = 2 (0x2), region = 53 }
  0x4d   :  { %119 = vsyncpa [#allocation3], 1 }
  0x4e   :  { %121 = vsyncpa [#allocation3 + $0x1], 1 }
  0x4f   :  { %122 = vsyncpa [#allocation4], 1 }
  0x50   :  { %124 = vsyncpa [#allocation4 + $0x1], 1 }

// kernel: tpu_custom_call.1
= control target key start
LH: loop header
LB: loop body
LE: loop exit
PB: predicated region body
PF: predicated region fallthrough
CT: control target
= control target key end

     0   :  { %s1783_s0 = inlined_call_operand.hbm [shape: f32[2,8,32], index: 0, kind: input, shape index: {}]   ;;  %s1784_s1 = inlined_call_operand.vmem [shape: f32[1,32], index: 1, kind: input, shape index: {}]   ;;  %s1785_s2 = inlined_call_operand.vmem [shape: f32[1,32], index: 2, kind: input, shape index: {}]   ;;  %s1786_s3 = inlined_call_operand.hbm [shape: f32[32,96], index: 3, kind: input, shape index: {}]   ;;  %s1787_s4 = inlined_call_operand.vmem [shape: f32[1,96], index: 4, kind: input, shape index: {}]   ;;  %s1788_s5 = inlined_call_operand.hbm [shape: f32[2,4,8,8], index: 5, kind: output, shape index: {0}]   ;;  %s1789_s6 = inlined_call_operand.hbm [shape: f32[2,4,8,8], index: 6, kind: output, shape index: {1}]   ;;  %s1790_s7 = inlined_call_operand.hbm [shape: f32[2,4,8,8], index: 7, kind: output, shape index: {2}]  }
   0x1   :  { %1796 = sst [smem:[#allocation16_spill]] %s1786_s3 }
   0x2   :  { %13 = vsyncpa [#allocation3], 0 }
   0x3   :  { %15 = vsyncpa [#allocation3 + $0x1], 0 }
   0x4   :  { %16 = vsyncpa [#allocation6], 0 }
   0x5   :  { %17 = vsyncpa [#allocation4], 0 }
   0x6   :  { %19 = vsyncpa [#allocation4 + $0x1], 0 }
   0x7   :  { %20 = vsyncpa [#allocation9], 0 }
   0x8   :  { %22 = vsyncpa [#allocation9 + $0x1], 0  ;;  %s1462_s24 = smov 0   ;;  %s1464_s25 = smov 0  }
   0x9   :  { %s1466_s26 = smov 0   ;;  %s1468_s27 = smov 0  }
   0xa   :  { %s1470_s28 = smov 0   ;;  %s1472_s29 = smov 0  }
   0xb LB: > { %s1493_s30 = sadd.s32 4294967295, %s1406_s29   ;;  %s1794_s8 = sadd.s32 4294967294, %s1406_s29   ;;  %s1406_s29 = sphi %s1472_s29, %s28_s29   ;;  %s1402_s28 = sphi %s1470_s28, %s1820_s28   ;;  %s1398_s27 = sphi %s1468_s27, %s1819_s27   ;;  %s1394_s26 = sphi %s1466_s26, %s1818_s26   ;;  %s1390_s25 = sphi %s1464_s25, %s1817_s25   ;;  %s1386_s24 = sphi %s1462_s24, %s1816_s24  }
   0xc   : > { %p62_p0 = scmp.ne.s32.totalorder %s1390_s25, %s1386_s24  ;;  %p1791_p1 = scmp.eq.s32.totalorder %s1493_s30, 0 }
   0xd   : > { %p178_p3 = scmp.eq.s32.totalorder %s1794_s8, 1  ;;  %p1057_p5 = scmp.ge.s32.totalorder %s1406_s29, 1 }
   0xe   : > { %p1504_p4 = por %p1791_p1, %p62_p0  ;;  %p241_p7 = scmp.lt.s32.totalorder %s1406_s29, 3 }
   0xf   : > { %p1509_p6 = por %p178_p3, %p62_p0  ;;  %s1408_s12 = smov [#allocation5]  }
  0x10   : > { %s1797_s9 = scalar_select %p1504_p4, 1, 0 }
  0x11   : > { %s1798_s10 = scalar_select %p1509_p6, 1, 0 }
  0x12   : > { %p1514_p8 = pnand %p1057_p5, %p241_p7  ;;  %s259_s13 = sshll.u32 %s1408_s12, 4  ;;  %s260_s13 = int_to_ptr.vmem [resolvable:$true] %s259_s13 }
  0x13   : > { %s40_s15 = sadd.s32 1, %s1402_s28  ;;  %s1801_s3 = sld [smem:[#allocation16_spill]] }
  0x14   : > { %s1799_s11 = scalar_select %p1514_p8, 1, 0 }
  0x15   : > { %p1120_p9 = pneg %p1514_p8 }
  0x17   : > { %p1523_p11 = pnand %p1120_p9, %p1791_p1 }
  0x19   : > { %s1202_s18 = scalar_lea.hbm %s1801_s3, 512  ;;  %p1204_p13 = pneg %p1523_p11 }
  0x1a   : > { %p1203_p12 = scmp.ne.s32.totalorder %s1801_s3, %s1202_s18  ;;  %p1209_p5 = scmp.lt.u32.totalorder %s1202_s18, %s1801_s3 }
  0x1c   : > { %p1205_p0 = pnand %p1204_p13, %p1203_p12 }
  0x1e   : > { %p1206_p3 = pneg %p1205_p0 }
  0x20   : > { %p1211_p7 = pnand %p1209_p5, %p1206_p3 }
  0x22   : > { %1214 = shalt.err (!%p1211_p7)
}
  0x23   : > { %s1215_s23 = scalar_lea.vmem %s260_s13, 512  ;;  %p1223_p2 = scmp.lt.s32.totalorder %s260_s13, %s260_s13 }
  0x24   : > { %p1216_p9 = scmp.ne.s32.totalorder %s260_s13, %s1215_s23  ;;  %p1224_p6 = scmp.lt.s32.totalorder %s1215_s23, %s1215_s23 }
  0x26   : > { %p1218_p10 = pnand %p1216_p9, %p1204_p13  ;;  %p1225_p4 = por %p1224_p6, %p1223_p2 }
  0x28   : > { %p1219_p1 = pneg %p1218_p10 }
  0x2a   : > { %p1226_p8 = pnand %p1225_p4, %p1219_p1 }
  0x2c   : > { %1229 = shalt.err (!%p1226_p8)
}
  0x2d   : > { %s1409_s12 = smov 128   ;;  %s1410_s16 = smov 8  }
  0x2e   : > { %1123 = dma.hbm_to_vmem [thread:$0]  (!%p1523_p11), %s1801_s3, 512, %s260_s13, [#allocation6], %s1409_s12, %s1409_s12, %s1410_s16  }
  0x2f   : > { %p42_p1 = scmp.ge.s32.totalorder %s40_s15, 2  ;;  %s49_s19 = sadd.s32 1, %s1394_s26 }
  0x30   : > { %p56_p2 = scmp.ne.s32.totalorder %s1394_s26, %s1390_s25  ;;  %p57_p4 = scmp.eq.s32.totalorder %s1406_s29, 0 }
  0x31   : > { %s1822_s15 = smov (%p42_p1, %s40_s15), 0  ;;  %p1804_p8 = scmp.eq.s32.totalorder %s1493_s30, 1 }
  0x32   : > { %1802 = sst [smem:[#allocation15_spill]] %s1822_s15  ;;  %p1550_p6 = por %p57_p4, %p56_p2 }
  0x33   : > { %p1556_p10 = por %p1804_p8, %p56_p2  ;;  %s44_s14 = ssub.s32 %s1402_s28, %s1822_s15 }
  0x34   : > { %p1139_p12 = scmp.lt.s32.totalorder %s1406_s29, 2  ;;  %p47_p11 = scmp.eq.s32.totalorder %s44_s14, 0 }
  0x35   : > { %s276_s13 = sand.u32 1, %s1394_s26   ;;  %s1061_s12 = sshll.u32 %s1402_s28, 7 }
  0x36   : > { %s1060_s22 = sshll.u32 %s276_s13, 3  ;;  %s1571_s18 = scalar_lea.hbm %s1783_s0, %s1061_s12 }
  0x37   : > { %s1565_s23 = scalar_select %p47_p11, %s1394_s26, %s49_s19  }
  0x38   : > { %s280_s8 = scalar_lea.vmem [#allocation2], %s1060_s22  ;;  %p1577_p13 = pnand %p1139_p12, %p1550_p6 }
  0x39   : > { %s288_s3 = sshll.u32 %s280_s8, 4  ;;  %s277_s19 = scalar_lea.sflag [#allocation3], %s276_s13  ;;  %s1573_s3 = int_to_ptr.vmem [resolvable:$true] %s288_s3 }
  0x3a   : > { %s1230_s15 = scalar_lea.hbm %s1571_s18, 128  ;;  %p1232_p3 = pneg %p1577_p13 }
  0x3b   : > { %p1231_p0 = scmp.ne.s32.totalorder %s1571_s18, %s1230_s15  ;;  %s1235_s12 = scalar_lea.hbm %s1783_s0, 256 }
  0x3c   : > { %p1236_p9 = scmp.lt.u32.totalorder %s1571_s18, %s1783_s0  ;;  %p1237_p1 = scmp.lt.u32.totalorder %s1235_s12, %s1230_s15 }
  0x3d   : > { %p1233_p5 = pnand %p1232_p3, %p1231_p0  ;;  %p1239_p4 = scmp.lt.u32.totalorder %s1230_s15, %s1571_s18 }
  0x3e   : > { %p1238_p2 = por %p1237_p1, %p1236_p9 }
  0x3f   : > { %p1234_p7 = pneg %p1233_p5 }
  0x40   : > { %p1240_p6 = por %p1239_p4, %p1238_p2 }
  0x42   : > { %p1241_p8 = pnand %p1240_p6, %p1234_p7 }
  0x44   : > { %1244 = shalt.err (!%p1241_p8)
}
  0x45   : > { %s1245_s13 = scalar_lea.vmem %s1573_s3, 128  ;;  %s1411_s17 = smov [#allocation2]  }
  0x46   : > { %p1246_p12 = scmp.ne.s32.totalorder %s1573_s3, %s1245_s13  ;;  %s1250_s22 = sshll.u32 %s1411_s17, 4  ;;  %s1251_s22 = int_to_ptr.vmem [resolvable:$false] %s1250_s22 }
  0x47   : > { %s1252_s8 = scalar_lea.vmem %s1251_s22, 256  ;;  %p1253_p5 = scmp.lt.s32.totalorder %s1573_s3, %s1251_s22 }
  0x48   : > { %p1248_p11 = pnand %p1246_p12, %p1232_p3  ;;  %p1254_p9 = scmp.lt.s32.totalorder %s1252_s8, %s1245_s13 }
  0x4a   : > { %p1249_p0 = pneg %p1248_p11  ;;  %p1255_p1 = por %p1254_p9, %p1253_p5 }
  0x4c   : > { %p1256_p2 = pnand %p1255_p1, %p1249_p0 }
  0x4e   : > { %1259 = shalt.err (!%p1256_p2)
}
  0x4f   : > { %1127 = dma.hbm_to_vmem [thread:$0]  (!%p1577_p13), %s1571_s18, 128, %s1573_s3, %s277_s19  }
  0x50   : > { %p1807_p7 = scmp.ne.s32.totalorder %s1799_s11, 0 }
  0x51   : > { %s1609_s15 = sand.u32 (!%p1807_p7), 1, %s1390_s25   ;;  %p1808_p3 = scmp.ne.s32.totalorder (!%p1807_p7), %s1797_s9, 0 }
  0x52   : > { %297 = sbr.rel (%p1807_p7) target bundleno = 1020 (0x3fc), region = 40  ;;  %s1063_s12 = sshll.u32 (!%p1807_p7), %s1609_s15, 3 }
  0x53   : > { %s300_s20 = scalar_lea.sflag (!%p1807_p7), [#allocation3], %s1609_s15  ;;  %s303_s16 = scalar_lea.vmem (!%p1807_p7), [#allocation2], %s1063_s12 }
  0x59   : > { %1369 = dma.done.wait (%p1808_p3), %s300_s20, 128  }
  0x5a   : > { %1371 = vsyncadd (%p1808_p3), %s300_s20, 4294967168  ;;  %p1809_p4 = scmp.eq.s32.totalorder %s1493_s30, 0 }
  0x5c   : > { %1373 = dma.done.wait (%p1809_p4), [#allocation6], 512   ;;  %p1810_p13 = pmov %p1809_p4 }
  0x5d   : > { %vm351_vm0 = vcmask 261120   ;;  %v348_v0 = vld [vmem:[%s303_s16] sm:$0xff]  ;;  %v380_v7 = vld [vmem:[#allocation5] sm:$0xff]  ;;  %v381_v8 = vld [vmem:[#allocation5 + $0x8] sm:$0xff]  ;;  %v1412_v10 = vmov 0.0|0.0   ;;  %vm1413_vm1 = vmmov 0  }
  0x5e   : > { %1375 = vsyncadd (%p1810_p13), [#allocation6], 4294966784  ;;  %v352_v1 = vsel %vm351_vm0, %v348_v0, 0.0  ;;  %v382_v9 = vld [vmem:[#allocation5 + $0x10] sm:$0xff]  ;;  %1102 = vmatprep.subr.bf16.mxu0 %v1412_v10  ;;  %v1103_v11 = vpack.c.bf16 %v381_v8, %v380_v7  ;;  %v383_v12 = vld [vmem:[#allocation5 + $0x18] sm:$0xff]  ;;  %v1414_v13 = vmov 0.0  }
  0x5f   : > { %353 = vadd.xlane.f32.xlu0 %v352_v1  ;;  %1099 = vmatprep.mubr.msk.f32.mxu0 %vm1413_vm1, %v1414_v13  ;;  %v1106_v14 = vpack.c.bf16 %v383_v12, %v382_v9  ;;  %v1068_v19 = vld [vmem:[%s1784_s1] ss:$0 sm:$0xff]  ;;  %s1415_s13 = smov 64   ;;  %s1416_s17 = smov 96   ;;  %vm501_vm2 = vcmask 64512  }
  0x60   : > { %1104 = vmatpush3.bf16.msra.mxu0 %v1103_v11  ;;  %v1069_v21 = vld [vmem:[%s1785_s2] ss:$0 sm:$0xff]  ;;  %s1634_s22 = sshll.u32 %s1609_s15, 5  ;;  %s842_s20 = sand.u32 1, %s1493_s30  }
  0x61   : > { %1105 = vmatprep.subr.bf16.mxu0 %v1412_v10  ;;  %v1070_v24 = vld [vmem:[%s1787_s4] ss:$0 sm:$0xff]  ;;  %s340_s8 = scalar_lea.vmem [#allocation8], %s1634_s22  ;;  %s1641_s16 = sshll.u32 %s1398_s27, 9 }
  0x62   : > { %s879_s12 = sshll.u32 %s340_s8, 4  ;;  %s1650_s11 = scalar_lea.hbm %s1789_s6, %s1641_s16  ;;  %s1643_s12 = int_to_ptr.vmem [resolvable:$true] %s879_s12 }
  0x63   : > { %s1653_s30 = scalar_lea.sflag [#allocation9], %s842_s20  ;;  %s1260_s27 = scalar_lea.vmem %s1643_s12, 512 }
  0x64   : > { %1107 = vmatpush3.bf16.msra.mxu0 %v1106_v14  ;;  %p1261_p6 = scmp.ne.s32.totalorder %s1643_s12, %s1260_s27  ;;  %s1417_s18 = smov [#allocation8]  }
  0x65   : > { %s1264_s14 = sshll.u32 %s1417_s18, 4  ;;  %s1265_s14 = int_to_ptr.vmem [resolvable:$false] %s1264_s14 }
  0x66   : > { %p1262_p8 = pnand %p1261_p6, %p1556_p10  ;;  %s1266_s19 = scalar_lea.vmem %s1265_s14, 1024 }
  0x67   : > { %p1267_p11 = scmp.lt.s32.totalorder %s1643_s12, %s1265_s14  ;;  %p1268_p0 = scmp.lt.s32.totalorder %s1266_s19, %s1260_s27 }
  0x68   : > { %p1263_p12 = pneg %p1262_p8 }
  0x69   : > { %p1269_p5 = por %p1268_p0, %p1267_p11 }
  0x6b   : > { %p1270_p9 = pnand %p1269_p5, %p1263_p12 }
  0xec   : > { %v354_v2 = vpop.xlane.xlu0 %353 }
  0xed   : > { %v356_v3 = vmul.f32 0.03125, %v354_v2 }
  0xef   : > { %v357_v4 = vsub.f32 %v348_v0, %v356_v3 }
  0xf1   : > { %v358_v5 = vmul.f32 %v357_v4, %v357_v4 }
  0xf3   : > { %v359_v6 = vsel %vm351_vm0, %v358_v5, 0.0 }
  0xf4   : > { %360 = vadd.xlane.f32.xlu0 %v359_v6 }
 0x181   : > { %v361_v15 = vpop.xlane.xlu0 %360 }
 0x182   : > { %v362_v16 = vmul.f32 0.03125, %v361_v15 }
 0x184   : > { %v363_v17 = vadd.f32 1e-05, %v362_v16 }
 0x186   : > { %1200 = vrsqrt.f32 %v363_v17 }
 0x190   : > { %v1201_v18 = vpop.eup %1200 }
 0x191   : > { %v365_v20 = vmul.f32 %v1201_v18, %v357_v4 }
 0x193   : > { %v372_v22 = vmul.f32 %v1068_v19, %v365_v20 }
 0x195   : > { %v379_v23 = vadd.f32 %v1069_v21, %v372_v22 }
 0x197   : > { %1100 = vmatmul.mubr.msk.f32.vlgmr.msra.gmra.mrb[0].mxu0 %vm351_vm0, %v379_v23 }
 0x26a   : > { %v460_v25 = vpop.f32.mrb[0].mxu0 }
 0x26b   : > { %v461_v26 = vadd.f32 %v1070_v24, %v460_v25  ;;  %v1101_v27 = vpop.f32.mrb[1].mxu0 }
 0x26d   : > { %670 = vrot.lane.b32.xlu1 %v461_v26, %s1415_s13  ;;  %v464_v28 = vmul.f32 0.35355338, %v461_v26 }
 0x271   : > { %466 = vrot.lane.b32.xlu1 %v461_v26, %s1416_s17 }
 0x29a   : > { %506 = vxpose.xlu1.b32.start.end [1/1] (short) (narrow) %v464_v28, 32 }
 0x2df   : > { %v671_v29 = vpop.permute.xlu1 %670 }
 0x2e0   : > { %673 = vxpose.xlu1.b32.start.end [1/1] (short) (narrow) %v671_v29, 32 }
 0x2e3   : > { %v467_v30 = vpop.permute.xlu1 %466 }
 0x2e4   : > { %469 = vxpose.xlu0.b32.start.end [1/1] (short) (narrow) %v467_v30, 32 }
 0x31a   : > { %v522_v31 = vpop.trf.xlu1 }
 0x31b   : > { %538 = vxpose.xlu0.b32.start.end [1/1] (short) (narrow) %v522_v31, 8 }
 0x31e   : > { %v523_v32 = vpop.trf.xlu1 }
 0x31f   : > { %570 = vxpose.xlu1.b32.start.end [1/1] (short) (narrow) %v523_v32, 8 }
 0x322   : > { %v524_v33 = vpop.trf.xlu1 }
 0x323   : > { %602 = vxpose.xlu0.b32.start.end [1/1] (short) (narrow) %v524_v33, 8 }
 0x326   : > { %v525_v34 = vpop.trf.xlu1 }
 0x327   : > { %634 = vxpose.xlu0.b32.start.end [1/1] (short) (narrow) %v525_v34, 8 }
 0x360   : > { %v689_v35 = vpop.trf.xlu1 }
 0x361   : > { %705 = vxpose.xlu0.b32.start.end [1/1] (short) (narrow) %v689_v35, 8 }
 0x364   : > { %v690_v36 = vpop.trf.xlu1  ;;  %v485_v37 = vpop.trf.xlu0 }
 0x365   : > { %737 = vxpose.xlu1.b32.start.end [1/1] (short) (narrow) %v690_v36, 8  ;;  %502 = vst.msk [vmem:[%s340_s8] sm:$0xff] %vm501_vm2, %v485_v37 }
 0x368   : > { %v691_v38 = vpop.trf.xlu1  ;;  %v486_v39 = vpop.trf.xlu0 }
 0x369   : > { %769 = vxpose.xlu0.b32.start.end [1/1] (short) (narrow) %v691_v38, 8  ;;  %503 = vst.msk [vmem:[%s340_s8 + $0x8] sm:$0xff] %vm501_vm2, %v486_v39 }
 0x36c   : > { %v692_v40 = vpop.trf.xlu1  ;;  %v487_v41 = vpop.trf.xlu0 }
 0x36d   : > { %801 = vxpose.xlu1.b32.start.end [1/1] (short) (narrow) %v692_v40, 8  ;;  %504 = vst.msk [vmem:[%s340_s8 + $0x10] sm:$0xff] %vm501_vm2, %v487_v41 }
 0x370   : > { %v488_v42 = vpop.trf.xlu0 }
 0x371   : > { %505 = vst.msk [vmem:[%s340_s8 + $0x18] sm:$0xff] %vm501_vm2, %v488_v42 }
 0x372   : > { %1273 = shalt.err (!%p1270_p9)
}
 0x373   : > { %s1274_s13 = scalar_lea.hbm %s1650_s11, 512  ;;  %s1278_s20 = scalar_lea.hbm %s1789_s6, 1024 }
 0x374   : > { %p1275_p1 = scmp.ne.s32.totalorder %s1650_s11, %s1274_s13  ;;  %p1279_p3 = scmp.lt.u32.totalorder %s1650_s11, %s1789_s6 }
 0x375   : > { %p1280_p4 = scmp.lt.u32.totalorder %s1278_s20, %s1274_s13  ;;  %p1282_p6 = scmp.lt.u32.totalorder %s1274_s13, %s1650_s11 }
 0x376   : > { %p1276_p2 = pnand %p1275_p1, %p1556_p10 }
 0x377   : > { %p1281_p13 = por %p1280_p4, %p1279_p3 }
 0x378   : > { %p1277_p7 = pneg %p1276_p2 }
 0x379   : > { %p1283_p8 = por %p1282_p6, %p1281_p13 }
 0x37b   : > { %p1284_p12 = pnand %p1283_p8, %p1277_p7 }
 0x37d   : > { %1287 = shalt.err (!%p1284_p12)
}
 0x37e   : > { %s1418_s27 = smov 128   ;;  %s1419_s18 = smov 8  }
 0x37f   : > { %1115 = dma.vmem_to_hbm [thread:$0]  (%p1556_p10), %s1643_s12, 512, %s1650_s11, %s1653_s30, %s1418_s27, %s1418_s27, %s1419_s18  }
 0x380   : > { %s333_s14 = scalar_lea.vmem [#allocation7], %s1634_s22  ;;  %s1690_s12 = scalar_lea.hbm %s1788_s5, %s1641_s16 }
 0x381   : > { %s862_s19 = sshll.u32 %s333_s14, 4  ;;  %s1420_s20 = smov [#allocation7]   ;;  %s1684_s19 = int_to_ptr.vmem [resolvable:$true] %s862_s19 }
 0x382   : > { %s1288_s8 = scalar_lea.vmem %s1684_s19, 512  ;;  %s1292_s3 = sshll.u32 %s1420_s20, 4  ;;  %s1293_s3 = int_to_ptr.vmem [resolvable:$false] %s1292_s3 }
 0x383   : > { %p1289_p11 = scmp.ne.s32.totalorder %s1684_s19, %s1288_s8  ;;  %s1294_s9 = scalar_lea.vmem %s1293_s3, 1024 }
 0x384   : > { %p1295_p9 = scmp.lt.s32.totalorder %s1684_s19, %s1293_s3  ;;  %p1296_p1 = scmp.lt.s32.totalorder %s1294_s9, %s1288_s8 }
 0x385   : > { %p1290_p0 = pnand %p1289_p11, %p1556_p10 }
 0x386   : > { %p1297_p2 = por %p1296_p1, %p1295_p9 }
 0x387   : > { %p1291_p5 = pneg %p1290_p0 }
 0x389   : > { %p1298_p7 = pnand %p1297_p2, %p1291_p5 }
 0x39b   : > { %v554_v43 = vpop.trf.xlu0 }
 0x39c   : > { %666 = vst.msk [vmem:[%s333_s14] sm:$0xff] %vm501_vm2, %v554_v43 }
 0x39f   : > { %v586_v44 = vpop.trf.xlu1 }
 0x3a0   : > { %667 = vst.msk [vmem:[%s333_s14 + $0x8] sm:$0xff] %vm501_vm2, %v586_v44 }
 0x3a3   : > { %v618_v45 = vpop.trf.xlu0 }
 0x3a4   : > { %668 = vst.msk [vmem:[%s333_s14 + $0x10] sm:$0xff] %vm501_vm2, %v618_v45 }
 0x3a7   : > { %v650_v46 = vpop.trf.xlu0 }
 0x3a8   : > { %669 = vst.msk [vmem:[%s333_s14 + $0x18] sm:$0xff] %vm501_vm2, %v650_v46 }
 0x3a9   : > { %1301 = shalt.err (!%p1298_p7)
}
 0x3aa   : > { %s1302_s14 = scalar_lea.hbm %s1690_s12, 512  ;;  %s1306_s20 = scalar_lea.hbm %s1788_s5, 1024 }
 0x3ab   : > { %p1303_p3 = scmp.ne.s32.totalorder %s1690_s12, %s1302_s14  ;;  %p1307_p6 = scmp.lt.u32.totalorder %s1690_s12, %s1788_s5 }
 0x3ac   : > { %p1308_p8 = scmp.lt.u32.totalorder %s1306_s20, %s1302_s14  ;;  %p1310_p11 = scmp.lt.u32.totalorder %s1302_s14, %s1690_s12 }
 0x3ad   : > { %p1304_p4 = pnand %p1303_p3, %p1556_p10 }
 0x3ae   : > { %p1309_p12 = por %p1308_p8, %p1307_p6 }
 0x3af   : > { %p1305_p13 = pneg %p1304_p4 }
 0x3b0   : > { %p1311_p0 = por %p1310_p11, %p1309_p12 }
 0x3b2   : > { %p1312_p5 = pnand %p1311_p0, %p1305_p13 }
 0x3b4   : > { %1315 = shalt.err (!%p1312_p5)
}
 0x3b5   : > { %s1811_s8 = scalar_lea.sflag [#allocation4], %s1609_s15  ;;  %s347_s11 = scalar_lea.vmem [#allocation10], %s1634_s22 }
 0x3b6   : > { %1114 = dma.vmem_to_hbm [thread:$0]  (%p1556_p10), %s1684_s19, 512, %s1690_s12, %s1811_s8, %s1418_s27, %s1418_s27, %s1419_s18  }
 0x3b7   : > { %s896_s9 = sshll.u32 %s347_s11, 4  ;;  %s1730_s19 = scalar_lea.hbm %s1790_s7, %s1641_s16  ;;  %s1724_s9 = int_to_ptr.vmem [resolvable:$true] %s896_s9 }
 0x3b8   : > { %s1316_s22 = scalar_lea.vmem %s1724_s9, 512  ;;  %s1421_s12 = smov [#allocation10]  }
 0x3b9   : > { %p1317_p9 = scmp.ne.s32.totalorder %s1724_s9, %s1316_s22  ;;  %s1320_s13 = sshll.u32 %s1421_s12, 4  ;;  %s1321_s13 = int_to_ptr.vmem [resolvable:$false] %s1320_s13 }
 0x3ba   : > { %s1322_s17 = scalar_lea.vmem %s1321_s13, 1024  ;;  %p1323_p7 = scmp.lt.s32.totalorder %s1724_s9, %s1321_s13 }
 0x3bb   : > { %p1318_p1 = pnand %p1317_p9, %p1556_p10  ;;  %p1324_p3 = scmp.lt.s32.totalorder %s1322_s17, %s1316_s22 }
 0x3bd   : > { %p1319_p2 = pneg %p1318_p1  ;;  %p1325_p4 = por %p1324_p3, %p1323_p7 }
 0x3bf   : > { %p1326_p13 = pnand %p1325_p4, %p1319_p2 }
 0x3e1   : > { %v721_v47 = vpop.trf.xlu0 }
 0x3e2   : > { %833 = vst.msk [vmem:[%s347_s11] sm:$0xff] %vm501_vm2, %v721_v47 }
 0x3e5   : > { %v753_v48 = vpop.trf.xlu1 }
 0x3e6   : > { %834 = vst.msk [vmem:[%s347_s11 + $0x8] sm:$0xff] %vm501_vm2, %v753_v48 }
 0x3e9   : > { %v785_v49 = vpop.trf.xlu0 }
 0x3ea   : > { %835 = vst.msk [vmem:[%s347_s11 + $0x10] sm:$0xff] %vm501_vm2, %v785_v49 }
 0x3ed   : > { %v817_v50 = vpop.trf.xlu1 }
 0x3ee   : > { %836 = vst.msk [vmem:[%s347_s11 + $0x18] sm:$0xff] %vm501_vm2, %v817_v50 }
 0x3ef   : > { %1329 = shalt.err (!%p1326_p13)
}
 0x3f0   : > { %s1330_s16 = scalar_lea.hbm %s1730_s19, 512  ;;  %s1334_s8 = scalar_lea.hbm %s1790_s7, 1024 }
 0x3f1   : > { %p1331_p6 = scmp.ne.s32.totalorder %s1730_s19, %s1330_s16  ;;  %p1335_p11 = scmp.lt.u32.totalorder %s1730_s19, %s1790_s7 }
 0x3f2   : > { %p1336_p0 = scmp.lt.u32.totalorder %s1334_s8, %s1330_s16  ;;  %p1338_p9 = scmp.lt.u32.totalorder %s1330_s16, %s1730_s19 }
 0x3f3   : > { %p1332_p8 = pnand %p1331_p6, %p1556_p10 }
 0x3f4   : > { %p1337_p5 = por %p1336_p0, %p1335_p11 }
 0x3f5   : > { %p1333_p12 = pneg %p1332_p8 }
 0x3f6   : > { %p1339_p1 = por %p1338_p9, %p1337_p5 }
 0x3f8   : > { %p1340_p2 = pnand %p1339_p1, %p1333_p12 }
 0x3fa   : > { %1343 = shalt.err (!%p1340_p2)
}
 0x3fb   : > { %1116 = dma.vmem_to_hbm [thread:$0]  (%p1556_p10), %s1724_s9, 512, %s1730_s19, %s1653_s30, %s1418_s27, %s1418_s27, %s1419_s18  }
 0x3fc PF: > { %s911_s14 = sand.u32 1, %s1386_s24   ;;  %p1812_p7 = scmp.ne.s32.totalorder %s1798_s10, 0 }
 0x3fd   : > { %p1813_p3 = scmp.ge.s32.totalorder %s1406_s29, 2  ;;  %s912_s22 = scalar_lea.sflag [#allocation4], %s911_s14 }
 0x3ff   : > { %p1129_p4 = pnand %p1813_p3, %p1812_p7 }
 0x401   : > { %1377 = dma.done.wait (!%p1129_p4), %s912_s22, 512  }
 0x402   : > { %1379 = vsyncadd (!%p1129_p4), %s912_s22, 4294966784  ;;  %s1814_s21 = sadd.s32 4294967294, %s1406_s29  }
 0x403   : > { %s920_s12 = sand.u32 1, %s1814_s21  }
 0x404   : > { %s921_s13 = scalar_lea.sflag [#allocation9], %s920_s12 }
 0x405   : > { %1381 = dma.done.wait (!%p1129_p4), %s921_s13, 1024  }
 0x406   : > { %1383 = vsyncadd (!%p1129_p4), %s921_s13, 4294966272  ;;  %s28_s29 = sadd.s32 1, %s1406_s29   ;;  %s1815_s30 = sld [smem:[#allocation15_spill]] }
 0x407   : > { %p25_p10 = scmp.ge.s32.totalorder %s28_s29, 4   ;;  %s1816_s24 = smov %s1390_s25 }
 0x408   : > { %s1817_s25 = smov %s1394_s26  ;;  %s1818_s26 = smov %s1565_s23 }
 0x409   : > { %s1819_s27 = smov %s1402_s28  ;;  %27 = sbr.rel (!%p25_p10) target bundleno = 11 (0xb), region = 121 }
 0x40c   : > { %s1820_s28 = smov %s1815_s30 }
 0x410   :  { %935 = vsyncpa [#allocation3], 1 }
 0x411   :  { %937 = vsyncpa [#allocation3 + $0x1], 1 }
 0x412   :  { %938 = vsyncpa [#allocation6], 1 }
 0x413   :  { %939 = vsyncpa [#allocation4], 1 }
 0x414   :  { %941 = vsyncpa [#allocation4 + $0x1], 1 }
 0x415   :  { %942 = vsyncpa [#allocation9], 1 }
 0x416   :  { %944 = vsyncpa [#allocation9 + $0x1], 1 }

</bundles_post_ra>
